<compile_context>
chip_gen: v5e
topology: v5e:2x2
jax: 0.10.0
libtpu: 0.0.40
codegen_flags: <defaults>
</compile_context>

<pallas_src>
import functools

import jax
import jax.numpy as jnp
from jax import lax
from jax.experimental import pallas as pl
from jax.experimental.pallas import tpu as pltpu


# ---------------------------------------------------------------------------
# Kernels
# ---------------------------------------------------------------------------
def latent_ode_kernel(z_ref, w1_ref, b1_ref, w2_ref, b2_ref, o_ref):
    # z: [B, Lp]  w1: [Lp, Hp]  b1: [1, Hp]  w2: [Hp, Lp]  b2: [1, Lp]
    # Lp/Hp are 128-lane multiples -> lane-dense loads and unmasked stores.
    z = z_ref[...].astype(jnp.float32)
    h = jnp.dot(z, w1_ref[...], preferred_element_type=jnp.float32)
    h = jnp.maximum(h + b1_ref[...].astype(jnp.float32), 0.0)
    out = jnp.dot(h.astype(w2_ref.dtype), w2_ref[...],
                  preferred_element_type=jnp.float32)
    o_ref[...] = (out + b2_ref[...].astype(jnp.float32)).astype(o_ref.dtype)


def latent_ode_euler_kernel(z0_ref, w1_ref, b1_ref, w2_ref, b2_ref, o_ref,
                            *, num_steps, dt, num_chains):
    # Whole trajectory in one kernel: weights loaded once, state carried in the
    # loop.  dt is folded into the second layer and bias casts are hoisted so
    # the serial per-step chain is as short as possible.
    w1 = w1_ref[...]
    b1 = b1_ref[...].astype(jnp.float32)
    w2dt = w2_ref[...] * dt                      # weak-typed dt: keeps w2 dtype
    b2dt = b2_ref[...].astype(jnp.float32) * dt
    z0 = z0_ref[...].astype(jnp.float32)

    b_tile = z0.shape[0]
    chunk = b_tile // num_chains
    # Independent row chunks -> independent MXU chains interleaved per step.
    chunks = tuple(z0[i * chunk:(i + 1) * chunk] for i in range(num_chains))

    def one(z):
        h = jnp.dot(z, w1, preferred_element_type=jnp.float32)
        h = jnp.maximum(h + b1, 0.0)
        return z + (jnp.dot(h.astype(w2dt.dtype), w2dt,
                            preferred_element_type=jnp.float32) + b2dt)

    def step(_, zs):
        return tuple(one(z) for z in zs)

    zs = lax.fori_loop(0, num_steps, step, chunks, unroll=4)
    for i in range(num_chains):
        o_ref[pl.ds(i * chunk, chunk), :] = zs[i].astype(o_ref.dtype)


# ---------------------------------------------------------------------------
# Wrappers
# ---------------------------------------------------------------------------
_VMEM_FULL = pl.BlockSpec(memory_space=pltpu.MemorySpace.VMEM)


def _pad_lanes(z, lp):
    """Zero-pad trailing (lane) dim of z up to lp (exact no-op mathematically)."""
    b, l = z.shape
    if l == lp:
        return z
    return jnp.pad(z, ((0, 0), (0, lp - l)))


def latent_ode_func(t, z, params, *, batch_tile=1024):
    """Pallas equivalent of LatentODEFunc.forward(t, z). `t` is unused (as in PyTorch)."""
    del t  # dynamics do not depend on t in the reference module
    w1, b1, w2, b2 = params["w1"], params["b1"], params["w2"], params["b2"]
    B, L = z.shape
    Lp, Hp = w1.shape
    zp = _pad_lanes(z, Lp)

    if B <= batch_tile:
        # Small batch: single shot, no grid, everything resident in VMEM.
        out = pl.pallas_call(
            latent_ode_kernel,
            out_shape=jax.ShapeDtypeStruct((B, Lp), z.dtype),
            in_specs=[_VMEM_FULL] * 5,
            out_specs=_VMEM_FULL,
        )(zp, w1, b1, w2, b2)
    else:
        # Large batch: tile rows over a parallel grid axis (>= 2 tiles by
        # construction -> both TCs on v7x); weights have constant index_maps
        # so they stay VMEM-resident across grid steps.
        nb = pl.cdiv(B, batch_tile)
        out = pl.pallas_call(
            latent_ode_kernel,
            out_shape=jax.ShapeDtypeStruct((B, Lp), z.dtype),
            grid=(nb,),
            in_specs=[
                pl.BlockSpec((batch_tile, Lp), lambda i: (i, 0)),
                pl.BlockSpec((Lp, Hp), lambda i: (0, 0)),
                pl.BlockSpec((1, Hp), lambda i: (0, 0)),
                pl.BlockSpec((Hp, Lp), lambda i: (0, 0)),
                pl.BlockSpec((1, Lp), lambda i: (0, 0)),
            ],
            out_specs=pl.BlockSpec((batch_tile, Lp), lambda i: (i, 0)),
            compiler_params=pltpu.CompilerParams(
                dimension_semantics=("parallel",)),
        )(zp, w1, b1, w2, b2)

    return out if L == Lp else out[:, :L]


def latent_ode_integrate(z0, params, *, dt, num_steps, batch_tile=256):
    """Fused explicit-Euler rollout z_{k+1} = z_k + dt * f(t_k, z_k).

    All `num_steps` evaluations of the dynamics MLP happen inside ONE
    pallas_call (lax.fori_loop in the kernel body), amortizing launch and
    weight-DMA overhead across the whole solve.  Large batches are row-tiled
    over a parallel grid axis so v7x can use both TensorCores.
    """
    w1, b1, w2, b2 = params["w1"], params["b1"], params["w2"], params["b2"]
    B, L = z0.shape
    Lp, Hp = w1.shape
    zp = _pad_lanes(z0, Lp)

    tile = B if B <= batch_tile else batch_tile
    num_chains = 2 if (tile >= 16 and tile % 2 == 0) else 1
    kernel = functools.partial(latent_ode_euler_kernel,
                               num_steps=int(num_steps), dt=float(dt),
                               num_chains=num_chains)

    if B <= batch_tile:
        out = pl.pallas_call(
            kernel,
            out_shape=jax.ShapeDtypeStruct((B, Lp), z0.dtype),
            in_specs=[_VMEM_FULL] * 5,
            out_specs=_VMEM_FULL,
        )(zp, w1, b1, w2, b2)
    else:
        nb = pl.cdiv(B, batch_tile)
        out = pl.pallas_call(
            kernel,
            out_shape=jax.ShapeDtypeStruct((B, Lp), z0.dtype),
            grid=(nb,),
            in_specs=[
                pl.BlockSpec((batch_tile, Lp), lambda i: (i, 0)),
                pl.BlockSpec((Lp, Hp), lambda i: (0, 0)),
                pl.BlockSpec((1, Hp), lambda i: (0, 0)),
                pl.BlockSpec((Hp, Lp), lambda i: (0, 0)),
                pl.BlockSpec((1, Lp), lambda i: (0, 0)),
            ],
            out_specs=pl.BlockSpec((batch_tile, Lp), lambda i: (i, 0)),
            compiler_params=pltpu.CompilerParams(
                dimension_semantics=("parallel",)),
        )(zp, w1, b1, w2, b2)

    return out if L == Lp else out[:, :L]


# ---------------------------------------------------------------------------
# Parameter helpers
# ---------------------------------------------------------------------------
def init_params(key, latent_dim, hidden_dim, dtype=jnp.float32):
    """nn.Linear-style init (uniform +-1/sqrt(fan_in)); weights stored [in, out]."""
    k1, k2, k3, k4 = jax.random.split(key, 4)
    bound1 = 1.0 / (latent_dim ** 0.5)
    bound2 = 1.0 / (hidden_dim ** 0.5)
    w1 = jax.random.uniform(k1, (latent_dim, hidden_dim), dtype, -bound1, bound1)
    b1 = jax.random.uniform(k2, (1, hidden_dim), dtype, -bound1, bound1)
    w2 = jax.random.uniform(k3, (hidden_dim, latent_dim), dtype, -bound2, bound2)
    b2 = jax.random.uniform(k4, (1, latent_dim), dtype, -bound2, bound2)
    return {"w1": w1, "b1": b1, "w2": w2, "b2": b2}


def pad_params(params, multiple=128):
    """Zero-pad hidden AND latent dims to a lane-width multiple.

    Exact no-op mathematically: padded W1 rows are zero (padded z columns
    contribute nothing), padded hidden units have zero weights/bias
    (ReLU(0)=0), padded W2 columns / b2 entries are zero so padded output
    columns stay exactly 0 (and remain 0 through the Euler rollout)."""
    def up(n):
        return ((n + multiple - 1) // multiple) * multiple

    L, H = params["w1"].shape
    Lp, Hp = up(L), up(H)
    if (Lp, Hp) == (L, H):
        return params
    return {
        "w1": jnp.pad(params["w1"], ((0, Lp - L), (0, Hp - H))),
        "b1": jnp.pad(params["b1"], ((0, 0), (0, Hp - H))),
        "w2": jnp.pad(params["w2"], ((0, Hp - H), (0, Lp - L))),
        "b2": jnp.pad(params["b2"], ((0, 0), (0, Lp - L))),
    }


# ---------------------------------------------------------------------------
# Plain-JAX references (match the PyTorch forward exactly)
# ---------------------------------------------------------------------------
def reference_forward(t, z, params):
    del t
    h = jnp.maximum(z @ params["w1"] + params["b1"], 0.0)
    return h @ params["w2"] + params["b2"]


def reference_euler(z0, params, dt, num_steps):
    def step(z, _):
        return z + dt * reference_forward(0.0, z, params), None
    z_final, _ = lax.scan(step, z0, None, length=num_steps)
    return z_final


if __name__ == "__main__":
    latent_dim, hidden_dim = 16, 32
    batch = 8

    key = jax.random.PRNGKey(0)
    kp, kz, kzb = jax.random.split(key, 3)
    params = init_params(kp, latent_dim, hidden_dim)
    params_lane = pad_params(params, multiple=128)   # lane-dense latent & hidden

    t = jnp.float32(0.0)  # unused, as in the PyTorch module

    # 1) Single dynamics evaluation f(t, z) — the module's forward.
    z = jax.random.normal(kz, (batch, latent_dim), jnp.float32)
    out = jax.block_until_ready(latent_ode_func(t, z, params_lane))
    ref = reference_forward(t, z, params)
    assert out.shape == (batch, latent_dim)
    assert jnp.allclose(out, ref, atol=1e-5, rtol=1e-5), "forward mismatch"

    # 2) Large batch: row-tiled grid with "parallel" semantics (2 tiles).
    big_batch = 1024
    zb = jax.random.normal(kzb, (big_batch, latent_dim), jnp.float32)
    out_b = jax.block_until_ready(
        latent_ode_func(t, zb, params_lane, batch_tile=512))
    ref_b = reference_forward(t, zb, params)
    assert jnp.allclose(out_b, ref_b, atol=1e-5, rtol=1e-5), "batched mismatch"

    # 3) Fused explicit-Euler rollout: many f(t,z) evals in one pallas_call.
    num_steps, dt = 64, 0.01
    z_final = jax.block_until_ready(
        latent_ode_integrate(z, params_lane, dt=dt, num_steps=num_steps))
    z_final_ref = reference_euler(z, params, dt, num_steps)
    assert jnp.allclose(z_final, z_final_ref, atol=1e-4, rtol=1e-4), "euler mismatch"

    # 4) Batched rollout: gridded (2 tiles) + two interleaved MXU chains/tile.
    zb2 = zb[:512]
    z_final_b = jax.block_until_ready(
        latent_ode_integrate(zb2, params_lane, dt=dt, num_steps=32,
                             batch_tile=256))
    z_final_b_ref = reference_euler(zb2, params, dt, 32)
    assert jnp.allclose(z_final_b, z_final_b_ref, atol=1e-4, rtol=1e-4), \
        "batched euler mismatch"

    print("KERNEL_OK")
</pallas_src>

<mosaic_0001>
module attributes {stable_mosaic.version = 11 : i64} {
  func.func @latent_ode_kernel(%arg0: memref<8x128xf32, #tpu.memory_space<vmem>>, %arg1: memref<128x128xf32, #tpu.memory_space<vmem>>, %arg2: memref<1x128xf32, #tpu.memory_space<vmem>>, %arg3: memref<128x128xf32, #tpu.memory_space<vmem>>, %arg4: memref<1x128xf32, #tpu.memory_space<vmem>>, %arg5: memref<8x128xf32, #tpu.memory_space<vmem>>) attributes {dimension_semantics = [], scalar_prefetch = 0 : i64, scratch_operands = 0 : i64, tpu.core_type = #tpu.core_type<tc>} {
    %c0 = arith.constant 0 : index
    %c0_0 = arith.constant 0 : index
    %0 = vector.load %arg0[%c0, %c0_0] : memref<8x128xf32, #tpu.memory_space<vmem>>, vector<8x128xf32>
    %c0_1 = arith.constant 0 : index
    %c0_2 = arith.constant 0 : index
    %1 = vector.load %arg1[%c0_1, %c0_2] : memref<128x128xf32, #tpu.memory_space<vmem>>, vector<128x128xf32>
    %cst = arith.constant dense<0.000000e+00> : vector<8x128xf32>
    %2 = tpu.matmul %0, %1, %cst {dimension_numbers = #tpu.dot_dimension_numbers<[1], [0], [0], [1], [0, 0, 1, 1], [], []>} : vector<8x128xf32>, vector<128x128xf32>, vector<8x128xf32> -> vector<8x128xf32>
    %c0_3 = arith.constant 0 : index
    %c0_4 = arith.constant 0 : index
    %3 = vector.load %arg2[%c0_3, %c0_4] : memref<1x128xf32, #tpu.memory_space<vmem>>, vector<1x128xf32>
    %4 = vector.broadcast %3 : vector<1x128xf32> to vector<8x128xf32>
    %5 = arith.addf %2, %4 : vector<8x128xf32>
    %cst_5 = arith.constant 0.000000e+00 : f32
    %6 = vector.broadcast %cst_5 : f32 to vector<8x128xf32>
    %7 = arith.maximumf %5, %6 : vector<8x128xf32>
    %c0_6 = arith.constant 0 : index
    %c0_7 = arith.constant 0 : index
    %8 = vector.load %arg3[%c0_6, %c0_7] : memref<128x128xf32, #tpu.memory_space<vmem>>, vector<128x128xf32>
    %cst_8 = arith.constant dense<0.000000e+00> : vector<8x128xf32>
    %9 = tpu.matmul %7, %8, %cst_8 {dimension_numbers = #tpu.dot_dimension_numbers<[1], [0], [0], [1], [0, 0, 1, 1], [], []>} : vector<8x128xf32>, vector<128x128xf32>, vector<8x128xf32> -> vector<8x128xf32>
    %c0_9 = arith.constant 0 : index
    %c0_10 = arith.constant 0 : index
    %10 = vector.load %arg4[%c0_9, %c0_10] : memref<1x128xf32, #tpu.memory_space<vmem>>, vector<1x128xf32>
    %11 = vector.broadcast %10 : vector<1x128xf32> to vector<8x128xf32>
    %12 = arith.addf %9, %11 : vector<8x128xf32>
    %c0_11 = arith.constant 0 : index
    %c0_12 = arith.constant 0 : index
    %13 = vector.load %arg5[%c0_11, %c0_12] : memref<8x128xf32, #tpu.memory_space<vmem>>, vector<8x128xf32>
    tpu.vector_store %arg5[%c0_11, %c0_12], %12 {strides = array<i32>} : memref<8x128xf32, #tpu.memory_space<vmem>>, vector<8x128xf32>,
    return
  }
}

</mosaic_0001>

<bundles_post_ra>
// kernel: tpu_custom_call.1
= control target key start
LH: loop header
LB: loop body
LE: loop exit
PB: predicated region body
PF: predicated region fallthrough
CT: control target
= control target key end

     0   :  { %10 = vsyncpa [#allocation3], 0  ;;  %s331_s0 = inlined_call_operand.hbm [shape: f32[8,128], index: 0, kind: input, shape index: {}]   ;;  %s332_s1 = inlined_call_operand.hbm [shape: f32[128,128], index: 1, kind: input, shape index: {}]   ;;  %s333_s2 = inlined_call_operand.vmem [shape: f32[1,128], index: 2, kind: input, shape index: {}]   ;;  %s334_s3 = inlined_call_operand.hbm [shape: f32[128,128], index: 3, kind: input, shape index: {}]   ;;  %s335_s4 = inlined_call_operand.vmem [shape: f32[1,128], index: 4, kind: input, shape index: {}]   ;;  %s336_s5 = inlined_call_operand.hbm [shape: f32[8,128], index: 5, kind: output, shape index: {}]  }
   0x1   :  { %11 = vsyncpa [#allocation6], 0  ;;  %s28_s20 = sshll.u32 %s332_s1, 4  ;;  %s29_s20 = int_to_ptr.hbm [resolvable:$true] %s28_s20 }
   0x2   :  { %12 = vsyncpa [#allocation4], 0  ;;  %s277_s21 = smov [#allocation5]   ;;  %s18_s25 = sshll.u32 %s331_s0, 4  ;;  %s19_s25 = int_to_ptr.hbm [resolvable:$true] %s18_s25 }
   0x3   :  { %s30_s22 = sshll.u32 %s277_s21, 4  ;;  %s278_s26 = smov 128   ;;  %s31_s22 = int_to_ptr.vmem [resolvable:$true] %s30_s22 }
   0x4   :  { %s279_s27 = smov 8   ;;  %s280_s28 = smov [#allocation2]  }
   0x5   :  { %36 = dma.hbm_to_vmem [thread:$0]  %s29_s20, 2048, %s31_s22, [#allocation6], %s278_s26, %s278_s26, %s279_s27  }
   0x6   :  { %s20_s29 = sshll.u32 %s280_s28, 4  ;;  %s43_s7 = sshll.u32 %s334_s3, 4  ;;  %s21_s29 = int_to_ptr.vmem [resolvable:$true] %s20_s29  ;;  %s44_s7 = int_to_ptr.hbm [resolvable:$true] %s43_s7 }
   0x7   :  { %23 = dma.hbm_to_vmem [thread:$0]  %s19_s25, 128, %s21_s29, [#allocation3]  }
   0x8   :  { %s281_s1 = smov [#allocation7]  }
   0x9   :  { %s45_s8 = sshll.u32 %s281_s1, 4  ;;  %s46_s8 = int_to_ptr.vmem [resolvable:$true] %s45_s8 }
   0xa   :  { %51 = dma.hbm_to_vmem [thread:$0]  %s44_s7, 2048, %s46_s8, [#allocation6], %s278_s26, %s278_s26, %s279_s27  }
   0xb   :  { %271 = dma.done.wait [#allocation3], 128  }
   0xc   :  { %272 = vsyncadd [#allocation3], 4294967168 }
   0xd   :  { %273 = dma.done.wait [#allocation6], 4096  }
   0xe   :  { %274 = vsyncadd [#allocation6], 4294963200  ;;  %v82_v0 = vld [vmem:[#allocation5 + $0x78] sm:$0xff]  ;;  %v81_v1 = vld [vmem:[#allocation5 + $0x70] sm:$0xff]  ;;  %s282_s11 = smov [#allocation8]   ;;  %s156_s15 = sshll.u32 %s336_s5, 4  ;;  %s157_s15 = int_to_ptr.hbm [resolvable:$true] %s156_s15 }
   0xf   :  { %87 = vmatpush.msra.mxu0 %v82_v0  ;;  %v80_v2 = vld [vmem:[#allocation5 + $0x68] sm:$0xff]  ;;  %v79_v3 = vld [vmem:[#allocation5 + $0x60] sm:$0xff]  ;;  %v123_v4 = vld [vmem:[#allocation7 + $0x78] sm:$0xff]  ;;  %s154_s12 = sshll.u32 %s282_s11, 4  ;;  %s155_s12 = int_to_ptr.vmem [resolvable:$true] %s154_s12 }
  0x10   :  { %v78_v5 = vld [vmem:[#allocation5 + $0x58] sm:$0xff]  ;;  %128 = vmatpush.msra.mxu1 %v123_v4  ;;  %v122_v6 = vld [vmem:[#allocation7 + $0x70] sm:$0xff]  ;;  %v121_v7 = vld [vmem:[#allocation7 + $0x68] sm:$0xff] }
  0x11   :  { %88 = vmatpush.msra.mxu0 %v81_v1  ;;  %v77_v8 = vld [vmem:[#allocation5 + $0x50] sm:$0xff]  ;;  %v120_v9 = vld [vmem:[#allocation7 + $0x60] sm:$0xff]  ;;  %v76_v10 = vld [vmem:[#allocation5 + $0x48] sm:$0xff] }
  0x12   :  { %129 = vmatpush.msra.mxu1 %v122_v6  ;;  %v119_v11 = vld [vmem:[#allocation7 + $0x58] sm:$0xff]  ;;  %v75_v12 = vld [vmem:[#allocation5 + $0x40] sm:$0xff]  ;;  %v118_v13 = vld [vmem:[#allocation7 + $0x50] sm:$0xff] }
  0x13   :  { %89 = vmatpush.msra.mxu0 %v80_v2  ;;  %v74_v14 = vld [vmem:[#allocation5 + $0x38] sm:$0xff]  ;;  %v117_v15 = vld [vmem:[#allocation7 + $0x48] sm:$0xff]  ;;  %v73_v16 = vld [vmem:[#allocation5 + $0x30] sm:$0xff] }
  0x14   :  { %130 = vmatpush.msra.mxu1 %v121_v7  ;;  %v116_v17 = vld [vmem:[#allocation7 + $0x40] sm:$0xff]  ;;  %v72_v18 = vld [vmem:[#allocation5 + $0x28] sm:$0xff]  ;;  %v115_v19 = vld [vmem:[#allocation7 + $0x38] sm:$0xff] }
  0x15   :  { %90 = vmatpush.msra.mxu0 %v79_v3  ;;  %v71_v20 = vld [vmem:[#allocation5 + $0x20] sm:$0xff]  ;;  %v114_v21 = vld [vmem:[#allocation7 + $0x30] sm:$0xff]  ;;  %v70_v22 = vld [vmem:[#allocation5 + $0x18] sm:$0xff] }
  0x16   :  { %131 = vmatpush.msra.mxu1 %v120_v9  ;;  %v113_v23 = vld [vmem:[#allocation7 + $0x28] sm:$0xff]  ;;  %v69_v24 = vld [vmem:[#allocation5 + $0x10] sm:$0xff]  ;;  %v112_v25 = vld [vmem:[#allocation7 + $0x20] sm:$0xff] }
  0x17   :  { %91 = vmatpush.msra.mxu0 %v78_v5  ;;  %v68_v26 = vld [vmem:[#allocation5 + $0x8] sm:$0xff]  ;;  %v111_v27 = vld [vmem:[#allocation7 + $0x18] sm:$0xff]  ;;  %v67_v28 = vld [vmem:[#allocation5] sm:$0xff] }
  0x18   :  { %132 = vmatpush.msra.mxu1 %v119_v11  ;;  %v66_v29 = vld [vmem:[#allocation2] sm:$0xff]  ;;  %v110_v30 = vld [vmem:[#allocation7 + $0x10] sm:$0xff]  ;;  %v109_v31 = vld [vmem:[#allocation7 + $0x8] sm:$0xff] }
  0x19   :  { %92 = vmatpush.msra.mxu0 %v77_v8  ;;  %v108_v32 = vld [vmem:[#allocation7] sm:$0xff]  ;;  %v173_v33 = vld [vmem:[%s333_s2] ss:$0 sm:$0xff] }
  0x1a   :  { %133 = vmatpush.msra.mxu1 %v118_v13  ;;  %v174_v37 = vld [vmem:[%s335_s4] ss:$0 sm:$0xff] }
  0x1b   :  { %93 = vmatpush.msra.mxu0 %v76_v10 }
  0x1c   :  { %134 = vmatpush.msra.mxu1 %v117_v15 }
  0x1d   :  { %94 = vmatpush.msra.mxu0 %v75_v12 }
  0x1e   :  { %135 = vmatpush.msra.mxu1 %v116_v17 }
  0x1f   :  { %95 = vmatpush.msra.mxu0 %v74_v14 }
  0x20   :  { %136 = vmatpush.msra.mxu1 %v115_v19 }
  0x21   :  { %96 = vmatpush.msra.mxu0 %v73_v16 }
  0x22   :  { %137 = vmatpush.msra.mxu1 %v114_v21 }
  0x23   :  { %97 = vmatpush.msra.mxu0 %v72_v18 }
  0x24   :  { %138 = vmatpush.msra.mxu1 %v113_v23 }
  0x25   :  { %98 = vmatpush.msra.mxu0 %v71_v20 }
  0x26   :  { %139 = vmatpush.msra.mxu1 %v112_v25 }
  0x27   :  { %99 = vmatpush.msra.mxu0 %v70_v22 }
  0x28   :  { %140 = vmatpush.msra.mxu1 %v111_v27 }
  0x29   :  { %100 = vmatpush.msra.mxu0 %v69_v24 }
  0x2a   :  { %141 = vmatpush.msra.mxu1 %v110_v30 }
  0x2b   :  { %101 = vmatpush.msra.mxu0 %v68_v26 }
  0x2c   :  { %142 = vmatpush.msra.mxu1 %v109_v31 }
  0x2d   :  { %102 = vmatpush.msra.mxu0 %v67_v28 }
  0x2e   :  { %103 = vmatmul.f32.vlgmr.msra.gmra.mxu0 %v66_v29  ;;  %143 = vmatpush.msra.mxu1 %v108_v32 }
  0xab   :  { %v104_v34 = vpop.f32.mrf.mxu0 }
  0xac   :  { %v105_v35 = vadd.f32 %v173_v33, %v104_v34 }
  0xae   :  { %v107_v36 = vmax.f32 %v105_v35, 0.0 }
  0xb0   :  { %144 = vmatmul.f32.vlgmr.msra.gmra.mxu1 %v107_v36 }
 0x12d   :  { %v145_v38 = vpop.f32.mrf.mxu1 }
 0x12e   :  { %v146_v39 = vadd.f32 %v174_v37, %v145_v38 }
 0x130   :  { %148 = vst [vmem:[#allocation8] sm:$0xff] %v146_v39 }
 0x131   :  { %159 = dma.vmem_to_hbm [thread:$0]  %s155_s12, 128, %s157_s15, [#allocation4]  }
 0x132   :  { %275 = dma.done.wait [#allocation4], 128  }
 0x133   :  { %276 = vsyncadd [#allocation4], 4294967168 }
 0x134   :  { %164 = vsyncpa [#allocation3], 1 }
 0x135   :  { %165 = vsyncpa [#allocation6], 1 }
 0x136   :  { %166 = vsyncpa [#allocation4], 1 }

</bundles_post_ra>
